<compile_context>
chip_gen: v7x
topology: tpu7x:2x2x1
jax: 0.10.0
libtpu: 0.0.40
codegen_flags: <defaults>
</compile_context>

<pallas_src>
import jax
import jax.numpy as jnp
from jax.experimental import pallas as pl
from jax.experimental.pallas import tpu as pltpu

LATENT_DIM = 256
ACTION_DIM = 64


def _round_up(x, m):
    return (x + m - 1) // m * m


def _transition_kernel(ls_ref, ae_ref, w1l_ref, w1a_ref, b1_ref, w2_ref, b2_ref, o_ref):
    # ls_ref:  [TB, latent_dim]        ae_ref:  [TB, action_dim]
    # w1l_ref: [latent_dim, latent_dim] (bf16)  w1a_ref: [action_dim, latent_dim] (bf16)
    # b1_ref:  [1, latent_dim] (f32)   w2_ref:  [latent_dim, latent_dim] (bf16)
    # b2_ref:  [1, latent_dim] (f32)   o_ref:   [TB, latent_dim]
    wdt = w1l_ref.dtype
    # Fused "concat + first Linear": two MXU matmuls summed in f32.
    h = jnp.dot(ls_ref[...].astype(wdt), w1l_ref[...],
                preferred_element_type=jnp.float32)
    h = h + jnp.dot(ae_ref[...].astype(wdt), w1a_ref[...],
                    preferred_element_type=jnp.float32)
    h = jnp.maximum(h + b1_ref[...], 0.0)          # bias + ReLU on the VPU, f32
    out = jnp.dot(h.astype(wdt), w2_ref[...],
                  preferred_element_type=jnp.float32)
    o_ref[...] = (out + b2_ref[...]).astype(o_ref.dtype)


def latent_transition_forward(latent_state, action_embedding, params, *, block_b=1024):
    """Pallas implementation of LatentTransitionModel.forward.

    latent_state:     [B, latent_dim]   (f32)
    action_embedding: [B, action_dim]   (f32)
    params: (w1_latent, w1_action, b1, w2, b2) with weights [in, out] (bf16),
            biases f32 — split in the same order as torch.cat([latent, action]).
    returns: [B, latent_dim]
    """
    w1l, w1a, b1, w2, b2 = params
    B, latent_dim = latent_state.shape
    action_dim = action_embedding.shape[1]

    # Keep biases 2D [1, latent_dim] so they map onto (sublane, lane).
    b1_2d = b1.reshape(1, latent_dim)
    b2_2d = b2.reshape(1, latent_dim)

    # Batch tile: multiple of 8 sublanes; capped so double-buffered activation
    # tiles stay comfortably inside v7x's VMEM (≈4.5 MB at TB=1024, f32).
    tb = min(block_b, _round_up(B, 8))
    bp = _round_up(B, tb)
    if bp != B:
        pad = bp - B
        latent_state = jnp.pad(latent_state, ((0, pad), (0, 0)))
        action_embedding = jnp.pad(action_embedding, ((0, pad), (0, 0)))

    grid = (bp // tb,)

    out = pl.pallas_call(
        _transition_kernel,
        out_shape=jax.ShapeDtypeStruct((bp, latent_dim), latent_state.dtype),
        grid_spec=pl.GridSpec(
            grid=grid,
            in_specs=[
                # Activations: stream one batch tile per grid step.
                pl.BlockSpec((tb, latent_dim), lambda i: (i, 0)),
                pl.BlockSpec((tb, action_dim), lambda i: (i, 0)),
                # Weights / biases: constant block index -> VMEM-resident.
                pl.BlockSpec((latent_dim, latent_dim), lambda i: (0, 0)),
                pl.BlockSpec((action_dim, latent_dim), lambda i: (0, 0)),
                pl.BlockSpec((1, latent_dim), lambda i: (0, 0)),
                pl.BlockSpec((latent_dim, latent_dim), lambda i: (0, 0)),
                pl.BlockSpec((1, latent_dim), lambda i: (0, 0)),
            ],
            out_specs=pl.BlockSpec((tb, latent_dim), lambda i: (i, 0)),
        ),
        compiler_params=pltpu.CompilerParams(
            dimension_semantics=("parallel",),   # shard batch tiles across TCs (v7x)
        ),
    )(latent_state, action_embedding, w1l, w1a, b1_2d, w2, b2_2d)

    if bp != B:
        out = out[:B]
    return out


def init_params(key, latent_dim=LATENT_DIM, action_dim=ACTION_DIM,
                weight_dtype=jnp.bfloat16):
    """nn.Linear-style init (uniform ±1/sqrt(fan_in)).

    w1 is stored pre-split and transposed: w1_latent [latent_dim, latent_dim],
    w1_action [action_dim, latent_dim], matching torch.cat([latent, action])
    ordering. Weights are cast to `weight_dtype` (bf16); biases stay f32.
    """
    k1, k2, k3, k4, k5 = jax.random.split(key, 5)
    in1 = latent_dim + action_dim
    bound1 = 1.0 / jnp.sqrt(in1)
    bound2 = 1.0 / jnp.sqrt(latent_dim)
    w1l = jax.random.uniform(k1, (latent_dim, latent_dim), jnp.float32, -bound1, bound1)
    w1a = jax.random.uniform(k2, (action_dim, latent_dim), jnp.float32, -bound1, bound1)
    b1 = jax.random.uniform(k3, (latent_dim,), jnp.float32, -bound1, bound1)
    w2 = jax.random.uniform(k4, (latent_dim, latent_dim), jnp.float32, -bound2, bound2)
    b2 = jax.random.uniform(k5, (latent_dim,), jnp.float32, -bound2, bound2)
    return (w1l.astype(weight_dtype), w1a.astype(weight_dtype), b1,
            w2.astype(weight_dtype), b2)
    # TODO(synk): optional fp8 weight path (v7x-native) gated on an accuracy check.


def reference_forward(latent_state, action_embedding, params):
    """Pure-JAX f32 reference (weights upcast) for correctness checking."""
    w1l, w1a, b1, w2, b2 = params
    h = (latent_state @ w1l.astype(jnp.float32)
         + action_embedding @ w1a.astype(jnp.float32) + b1)
    h = jnp.maximum(h, 0.0)
    return h @ w2.astype(jnp.float32) + b2


if __name__ == "__main__":
    key = jax.random.PRNGKey(0)
    kp, kl, ka = jax.random.split(key, 3)

    B = 8  # small demo batch (multiple of 8 sublanes)
    params = init_params(kp)

    latent_state = jax.random.normal(kl, (B, LATENT_DIM), jnp.float32)
    action_embedding = jax.random.normal(ka, (B, ACTION_DIM), jnp.float32)

    out = latent_transition_forward(latent_state, action_embedding, params)
    out = jax.block_until_ready(out)

    ref = reference_forward(latent_state, action_embedding, params)
    assert out.shape == (B, LATENT_DIM)
    # bf16 MXU inputs with f32 accumulation -> loosened tolerance vs f32 reference.
    assert jnp.allclose(out, ref, atol=5e-2, rtol=5e-2), "mismatch vs reference"

    print("KERNEL_OK")
</pallas_src>

<mosaic_0001>
module attributes {stable_mosaic.version = 11 : i64} {
  func.func @_transition_kernel(%arg0: i32, %arg1: memref<8x256xf32, #tpu.memory_space<vmem>>, %arg2: memref<8x64xf32, #tpu.memory_space<vmem>>, %arg3: memref<256x256xbf16, #tpu.memory_space<vmem>>, %arg4: memref<64x256xbf16, #tpu.memory_space<vmem>>, %arg5: memref<1x256xf32, #tpu.memory_space<vmem>>, %arg6: memref<256x256xbf16, #tpu.memory_space<vmem>>, %arg7: memref<1x256xf32, #tpu.memory_space<vmem>>, %arg8: memref<8x256xf32, #tpu.memory_space<vmem>>) attributes {dimension_semantics = [#tpu.dimension_semantics<parallel>], iteration_bounds = array<i64: 1>, scalar_prefetch = 0 : i64, scratch_operands = 0 : i64, tpu.core_type = #tpu.core_type<tc>, window_params = [{transform_indices = @transform_0, window_bounds = array<i64: 8, 256>}, {transform_indices = @transform_1, window_bounds = array<i64: 8, 64>}, {pipeline_mode = #tpu.pipeline_mode<synchronous>, transform_indices = @transform_2, window_bounds = array<i64: 256, 256>}, {pipeline_mode = #tpu.pipeline_mode<synchronous>, transform_indices = @transform_3, window_bounds = array<i64: 64, 256>}, {pipeline_mode = #tpu.pipeline_mode<synchronous>, transform_indices = @transform_4, window_bounds = array<i64: 1, 256>}, {pipeline_mode = #tpu.pipeline_mode<synchronous>, transform_indices = @transform_5, window_bounds = array<i64: 256, 256>}, {pipeline_mode = #tpu.pipeline_mode<synchronous>, transform_indices = @transform_6, window_bounds = array<i64: 1, 256>}, {transform_indices = @transform_7, window_bounds = array<i64: 8, 256>}]} {
    %c0 = arith.constant 0 : index
    %c0_0 = arith.constant 0 : index
    %0 = vector.load %arg1[%c0, %c0_0] : memref<8x256xf32, #tpu.memory_space<vmem>>, vector<8x256xf32>
    %1 = arith.truncf %0 : vector<8x256xf32> to vector<8x256xbf16>
    %c0_1 = arith.constant 0 : index
    %c0_2 = arith.constant 0 : index
    %2 = vector.load %arg3[%c0_1, %c0_2] : memref<256x256xbf16, #tpu.memory_space<vmem>>, vector<256x256xbf16>
    %cst = arith.constant dense<0.000000e+00> : vector<8x256xf32>
    %3 = tpu.matmul %1, %2, %cst {dimension_numbers = #tpu.dot_dimension_numbers<[1], [0], [0], [1], [0, 0, 1, 1], [], []>} : vector<8x256xbf16>, vector<256x256xbf16>, vector<8x256xf32> -> vector<8x256xf32>
    %c0_3 = arith.constant 0 : index
    %c0_4 = arith.constant 0 : index
    %4 = vector.load %arg2[%c0_3, %c0_4] : memref<8x64xf32, #tpu.memory_space<vmem>>, vector<8x64xf32>
    %5 = arith.truncf %4 : vector<8x64xf32> to vector<8x64xbf16>
    %c0_5 = arith.constant 0 : index
    %c0_6 = arith.constant 0 : index
    %6 = vector.load %arg4[%c0_5, %c0_6] : memref<64x256xbf16, #tpu.memory_space<vmem>>, vector<64x256xbf16>
    %cst_7 = arith.constant dense<0.000000e+00> : vector<8x256xf32>
    %7 = tpu.matmul %5, %6, %cst_7 {dimension_numbers = #tpu.dot_dimension_numbers<[1], [0], [0], [1], [0, 0, 1, 1], [], []>} : vector<8x64xbf16>, vector<64x256xbf16>, vector<8x256xf32> -> vector<8x256xf32>
    %8 = arith.addf %3, %7 : vector<8x256xf32>
    %c0_8 = arith.constant 0 : index
    %c0_9 = arith.constant 0 : index
    %9 = vector.load %arg5[%c0_8, %c0_9] : memref<1x256xf32, #tpu.memory_space<vmem>>, vector<1x256xf32>
    %10 = vector.broadcast %9 : vector<1x256xf32> to vector<8x256xf32>
    %11 = arith.addf %8, %10 : vector<8x256xf32>
    %cst_10 = arith.constant 0.000000e+00 : f32
    %12 = vector.broadcast %cst_10 : f32 to vector<8x256xf32>
    %13 = arith.maximumf %11, %12 : vector<8x256xf32>
    %14 = arith.truncf %13 : vector<8x256xf32> to vector<8x256xbf16>
    %c0_11 = arith.constant 0 : index
    %c0_12 = arith.constant 0 : index
    %15 = vector.load %arg6[%c0_11, %c0_12] : memref<256x256xbf16, #tpu.memory_space<vmem>>, vector<256x256xbf16>
    %cst_13 = arith.constant dense<0.000000e+00> : vector<8x256xf32>
    %16 = tpu.matmul %14, %15, %cst_13 {dimension_numbers = #tpu.dot_dimension_numbers<[1], [0], [0], [1], [0, 0, 1, 1], [], []>} : vector<8x256xbf16>, vector<256x256xbf16>, vector<8x256xf32> -> vector<8x256xf32>
    %c0_14 = arith.constant 0 : index
    %c0_15 = arith.constant 0 : index
    %17 = vector.load %arg7[%c0_14, %c0_15] : memref<1x256xf32, #tpu.memory_space<vmem>>, vector<1x256xf32>
    %18 = vector.broadcast %17 : vector<1x256xf32> to vector<8x256xf32>
    %19 = arith.addf %16, %18 : vector<8x256xf32>
    %c0_16 = arith.constant 0 : index
    %c0_17 = arith.constant 0 : index
    %20 = vector.load %arg8[%c0_16, %c0_17] : memref<8x256xf32, #tpu.memory_space<vmem>>, vector<8x256xf32>
    tpu.vector_store %arg8[%c0_16, %c0_17], %19 {strides = array<i32>} : memref<8x256xf32, #tpu.memory_space<vmem>>, vector<8x256xf32>,
    return
  }
  func.func @transform_0(%arg0: i32) -> (i32, i32) {
    %c0_i32 = arith.constant 0 : i32
    %c0_i32_0 = arith.constant 0 : i32
    return %arg0, %c0_i32 : i32, i32
  }
  func.func @transform_1(%arg0: i32) -> (i32, i32) {
    %c0_i32 = arith.constant 0 : i32
    %c0_i32_0 = arith.constant 0 : i32
    return %arg0, %c0_i32 : i32, i32
  }
  func.func @transform_2(%arg0: i32) -> (i32, i32) {
    %c0_i32 = arith.constant 0 : i32
    %c0_i32_0 = arith.constant 0 : i32
    %c0_i32_1 = arith.constant 0 : i32
    return %c0_i32, %c0_i32_0 : i32, i32
  }
  func.func @transform_3(%arg0: i32) -> (i32, i32) {
    %c0_i32 = arith.constant 0 : i32
    %c0_i32_0 = arith.constant 0 : i32
    %c0_i32_1 = arith.constant 0 : i32
    return %c0_i32, %c0_i32_0 : i32, i32
  }
  func.func @transform_4(%arg0: i32) -> (i32, i32) {
    %c0_i32 = arith.constant 0 : i32
    %c0_i32_0 = arith.constant 0 : i32
    %c0_i32_1 = arith.constant 0 : i32
    return %c0_i32, %c0_i32_0 : i32, i32
  }
  func.func @transform_5(%arg0: i32) -> (i32, i32) {
    %c0_i32 = arith.constant 0 : i32
    %c0_i32_0 = arith.constant 0 : i32
    %c0_i32_1 = arith.constant 0 : i32
    return %c0_i32, %c0_i32_0 : i32, i32
  }
  func.func @transform_6(%arg0: i32) -> (i32, i32) {
    %c0_i32 = arith.constant 0 : i32
    %c0_i32_0 = arith.constant 0 : i32
    %c0_i32_1 = arith.constant 0 : i32
    return %c0_i32, %c0_i32_0 : i32, i32
  }
  func.func @transform_7(%arg0: i32) -> (i32, i32) {
    %c0_i32 = arith.constant 0 : i32
    %c0_i32_0 = arith.constant 0 : i32
    return %arg0, %c0_i32 : i32, i32
  }
}

</mosaic_0001>

<bundles_post_ra>
// kernel: tpu_custom_call.1
= control target key start
LH: loop header
LB: loop body
LE: loop exit
PB: predicated region body
PF: predicated region fallthrough
CT: control target
= control target key end

     0   :  { %12 = vsyncpa [#allocation3], 0  ;;  %s1172_s0 = inlined_call_operand.hbm [shape: f32[8,256], index: 0, kind: input, shape index: {}]   ;;  %s1173_s1 = inlined_call_operand.hbm [shape: f32[8,64], index: 1, kind: input, shape index: {}]   ;;  %s1174_s2 = inlined_call_operand.hbm [shape: bf16[256,256], index: 2, kind: input, shape index: {}]   ;;  %s1175_s3 = inlined_call_operand.hbm [shape: bf16[64,256], index: 3, kind: input, shape index: {}]   ;;  %s1176_s4 = inlined_call_operand.vmem [shape: f32[1,256], index: 4, kind: input, shape index: {}]   ;;  %s1177_s5 = inlined_call_operand.hbm [shape: bf16[256,256], index: 5, kind: input, shape index: {}]   ;;  %s1178_s6 = inlined_call_operand.vmem [shape: f32[1,256], index: 6, kind: input, shape index: {}]   ;;  %s1179_s7 = inlined_call_operand.hbm [shape: f32[8,256], index: 7, kind: output, shape index: {}]  }
   0x1   :  { %13 = vsyncpa [#allocation6], 0 }
   0x2   :  { %14 = vsyncpa [#allocation9], 0 }
   0x3   :  { %15 = vsyncpa [#allocation4], 0  ;;  %s1036_s24 = smov [#allocation5]   ;;  %s896_s28 = scalar_lea.hbm %s1173_s1, 128 }
   0x4   :  { %s32_s25 = sshll.u32 %s1036_s24, 4  ;;  %p897_p0 = scmp.ne.s32.totalorder %s1173_s1, %s896_s28  ;;  %s33_s25 = int_to_ptr.vmem [resolvable:$true] %s32_s25 }
   0x5   :  { %p900_p1 = scmp.lt.u32.totalorder %s896_s28, %s1173_s1 }
   0x7   :  { %p902_p2 = pnand %p900_p1, %p897_p0 }
   0x9   :  { %905 = shalt.err (!%p902_p2)
}
   0xa   :  { %s906_s10 = scalar_lea.vmem %s33_s25, 128  ;;  %p911_p4 = scmp.lt.s32.totalorder %s33_s25, %s33_s25 }
   0xb   :  { %p907_p3 = scmp.ne.s32.totalorder %s33_s25, %s906_s10  ;;  %p912_p5 = scmp.lt.s32.totalorder %s906_s10, %s906_s10 }
   0xd   :  { %p913_p6 = por %p912_p5, %p911_p4 }
   0xf   :  { %p914_p7 = pnand %p913_p6, %p907_p3 }
  0x11   :  { %917 = shalt.err (!%p914_p7)
}
  0x12   :  { %35 = dma.hbm_to_vmem [thread:$0]  %s1173_s1, 128, %s33_s25, [#allocation6]  }
  0x13   :  { %s1037_s13 = smov [#allocation8]   ;;  %s1038_s15 = smov [#allocation2]  }
  0x14   :  { %s53_s14 = sshll.u32 %s1037_s13, 4  ;;  %s22_s16 = sshll.u32 %s1038_s15, 4  ;;  %s54_s14 = int_to_ptr.vmem [resolvable:$true] %s53_s14  ;;  %s23_s16 = int_to_ptr.vmem [resolvable:$true] %s22_s16 }
  0x15   :  { %s918_s19 = scalar_lea.hbm %s1175_s3, 1024 }
  0x16   :  { %p919_p8 = scmp.ne.s32.totalorder %s1175_s3, %s918_s19  ;;  %p922_p9 = scmp.lt.u32.totalorder %s918_s19, %s1175_s3 }
  0x18   :  { %p924_p10 = pnand %p922_p9, %p919_p8 }
  0x1a   :  { %927 = shalt.err (!%p924_p10)
}
  0x1b   :  { %s928_s1 = scalar_lea.vmem %s54_s14, 1024  ;;  %p933_p12 = scmp.lt.s32.totalorder %s54_s14, %s54_s14 }
  0x1c   :  { %p929_p11 = scmp.ne.s32.totalorder %s54_s14, %s928_s1  ;;  %p934_p13 = scmp.lt.s32.totalorder %s928_s1, %s928_s1 }
  0x1e   :  { %p935_p0 = por %p934_p13, %p933_p12 }
  0x20   :  { %p936_p1 = pnand %p935_p0, %p929_p11 }
  0x22   :  { %939 = shalt.err (!%p936_p1)
}
  0x23   :  { %s1039_s24 = smov 128   ;;  %s1040_s25 = smov 8  }
  0x24   :  { %59 = dma.hbm_to_vmem [thread:$0]  %s1175_s3, 1024, %s54_s14, [#allocation9], %s1039_s24, %s1039_s24, %s1040_s25  }
  0x25   :  { %s940_s30 = scalar_lea.hbm %s1172_s0, 256 }
  0x26   :  { %p941_p2 = scmp.ne.s32.totalorder %s1172_s0, %s940_s30  ;;  %p944_p3 = scmp.lt.u32.totalorder %s940_s30, %s1172_s0 }
  0x28   :  { %p946_p4 = pnand %p944_p3, %p941_p2 }
  0x2a   :  { %949 = shalt.err (!%p946_p4)
}
  0x2b   :  { %s950_s12 = scalar_lea.vmem %s23_s16, 256  ;;  %p955_p6 = scmp.lt.s32.totalorder %s23_s16, %s23_s16 }
  0x2c   :  { %p951_p5 = scmp.ne.s32.totalorder %s23_s16, %s950_s12  ;;  %p956_p7 = scmp.lt.s32.totalorder %s950_s12, %s950_s12 }
  0x2e   :  { %p957_p8 = por %p956_p7, %p955_p6 }
  0x30   :  { %p958_p9 = pnand %p957_p8, %p951_p5 }
  0x32   :  { %961 = shalt.err (!%p958_p9)
}
  0x33   :  { %25 = dma.hbm_to_vmem [thread:$0]  %s1172_s0, 256, %s23_s16, [#allocation3]  }
  0x34   :  { %s1041_s14 = smov [#allocation7]   ;;  %s1042_s17 = smov [#allocation10]  }
  0x35   :  { %s41_s15 = sshll.u32 %s1041_s14, 4  ;;  %s67_s18 = sshll.u32 %s1042_s17, 4  ;;  %s42_s15 = int_to_ptr.vmem [resolvable:$true] %s41_s15  ;;  %s68_s18 = int_to_ptr.vmem [resolvable:$true] %s67_s18 }
  0x36   :  { %s962_s21 = scalar_lea.hbm %s1174_s2, 4096 }
  0x37   :  { %p963_p10 = scmp.ne.s32.totalorder %s1174_s2, %s962_s21  ;;  %p966_p11 = scmp.lt.u32.totalorder %s962_s21, %s1174_s2 }
  0x39   :  { %p968_p12 = pnand %p966_p11, %p963_p10 }
  0x3b   :  { %971 = shalt.err (!%p968_p12)
}
  0x3c   :  { %s972_s0 = scalar_lea.vmem %s42_s15, 4096  ;;  %p977_p0 = scmp.lt.s32.totalorder %s42_s15, %s42_s15 }
  0x3d   :  { %p973_p13 = scmp.ne.s32.totalorder %s42_s15, %s972_s0  ;;  %p978_p1 = scmp.lt.s32.totalorder %s972_s0, %s972_s0 }
  0x3f   :  { %p979_p2 = por %p978_p1, %p977_p0 }
  0x41   :  { %p980_p3 = pnand %p979_p2, %p973_p13 }
  0x43   :  { %983 = shalt.err (!%p980_p3)
}
  0x44   :  { %47 = dma.hbm_to_vmem [thread:$0]  %s1174_s2, 4096, %s42_s15, [#allocation6], %s1039_s24, %s1039_s24, %s1040_s25  }
  0x45   :  { %s984_s30 = scalar_lea.hbm %s1177_s5, 4096 }
  0x46   :  { %p985_p4 = scmp.ne.s32.totalorder %s1177_s5, %s984_s30  ;;  %p988_p5 = scmp.lt.u32.totalorder %s984_s30, %s1177_s5 }
  0x48   :  { %p990_p6 = pnand %p988_p5, %p985_p4 }
  0x4a   :  { %993 = shalt.err (!%p990_p6)
}
  0x4b   :  { %s994_s12 = scalar_lea.vmem %s68_s18, 4096  ;;  %p999_p8 = scmp.lt.s32.totalorder %s68_s18, %s68_s18 }
  0x4c   :  { %p995_p7 = scmp.ne.s32.totalorder %s68_s18, %s994_s12  ;;  %p1000_p9 = scmp.lt.s32.totalorder %s994_s12, %s994_s12 }
  0x4e   :  { %p1001_p10 = por %p1000_p9, %p999_p8 }
  0x50   :  { %p1002_p11 = pnand %p1001_p10, %p995_p7 }
  0x52   :  { %1005 = shalt.err (!%p1002_p11)
}
  0x53   :  { %73 = dma.hbm_to_vmem [thread:$0]  %s1177_s5, 4096, %s68_s18, [#allocation9], %s1039_s24, %s1039_s24, %s1040_s25  }
  0x54   :  { %1028 = dma.done.wait [#allocation3], 256  }
  0x55   :  { %1029 = vsyncadd [#allocation3], 4294967040 }
  0x56   :  { %1030 = dma.done.wait [#allocation6], 4224  }
  0x57   :  { %1031 = vsyncadd [#allocation6], 4294963072 }
  0x58   :  { %1032 = dma.done.wait [#allocation9], 5120  }
  0x59   :  { %1033 = vsyncadd [#allocation9], 4294962176  ;;  %v1043_v0 = vmov 0   ;;  %v788_v1 = vld [vmem:[#allocation7 + $0x4] ss:$8 sps:$4 sm:$0xff]   ;;  %v128_v25 = vld [vmem:[#allocation5] sm:$0xff] }
  0x5a   :  { %214 = vmatprep.mubr.bf16.mxu0 %v1043_v0  ;;  %v790_v2 = vld [vmem:[#allocation7] ss:$8 sps:$4 sm:$0xff]   ;;  %383 = vmatprep.subr.bf16.mxu1 %v788_v1  ;;  %v791_v3 = vld [vmem:[#allocation7 + $0x14] ss:$8 sps:$4 sm:$0xff]   ;;  %v793_v4 = vld [vmem:[#allocation7 + $0x10] ss:$8 sps:$4 sm:$0xff]   ;;  %v129_v30 = vpack.c.bf16 %v128_v25, %v128_v25 }
  0x5b   :  { %384 = vmatpush1.bf16.msra.mxu1 %v790_v2  ;;  %v794_v5 = vld [vmem:[#allocation7 + $0x24] ss:$8 sps:$4 sm:$0xff]   ;;  %v796_v6 = vld [vmem:[#allocation7 + $0x20] ss:$8 sps:$4 sm:$0xff]   ;;  %v797_v7 = vld [vmem:[#allocation7 + $0x34] ss:$8 sps:$4 sm:$0xff]  }
  0x5c   :  { %385 = vmatprep.subr.bf16.mxu1 %v791_v3  ;;  %v799_v8 = vld [vmem:[#allocation7 + $0x30] ss:$8 sps:$4 sm:$0xff]   ;;  %v800_v9 = vld [vmem:[#allocation7 + $0x44] ss:$8 sps:$4 sm:$0xff]   ;;  %v802_v10 = vld [vmem:[#allocation7 + $0x40] ss:$8 sps:$4 sm:$0xff]  }
  0x5d   :  { %v803_v11 = vld [vmem:[#allocation7 + $0x54] ss:$8 sps:$4 sm:$0xff]   ;;  %v823_v12 = vld [vmem:[#allocation8 + $0x4] ss:$8 sps:$4 sm:$0xff]   ;;  %v826_v13 = vld [vmem:[#allocation8] ss:$8 sps:$4 sm:$0xff]  }
  0x5e   :  { %182 = vmatprep.subr.bf16.mxu0 %v823_v12  ;;  %v805_v14 = vld [vmem:[#allocation7 + $0x50] ss:$8 sps:$4 sm:$0xff]   ;;  %v829_v15 = vld [vmem:[#allocation8 + $0x14] ss:$8 sps:$4 sm:$0xff]   ;;  %v806_v17 = vld [vmem:[#allocation7 + $0x64] ss:$8 sps:$4 sm:$0xff]  }
  0x5f   :  { %386 = vmatpush1.bf16.msra.mxu1 %v793_v4  ;;  %183 = vmatpush1.bf16.msra.mxu0 %v826_v13  ;;  %v832_v16 = vld [vmem:[#allocation8 + $0x10] ss:$8 sps:$4 sm:$0xff]   ;;  %v835_v18 = vld [vmem:[#allocation8 + $0x24] ss:$8 sps:$4 sm:$0xff]   ;;  %v808_v19 = vld [vmem:[#allocation7 + $0x60] ss:$8 sps:$4 sm:$0xff]  }
  0x60   :  { %387 = vmatprep.subr.bf16.mxu1 %v794_v5  ;;  %184 = vmatprep.subr.bf16.mxu0 %v829_v15  ;;  %v838_v20 = vld [vmem:[#allocation8 + $0x20] ss:$8 sps:$4 sm:$0xff]   ;;  %v809_v21 = vld [vmem:[#allocation7 + $0x74] ss:$8 sps:$4 sm:$0xff]   ;;  %v811_v23 = vld [vmem:[#allocation7 + $0x70] ss:$8 sps:$4 sm:$0xff]  }
  0x61   :  { %v841_v22 = vld [vmem:[#allocation8 + $0x34] ss:$8 sps:$4 sm:$0xff]   ;;  %v844_v24 = vld [vmem:[#allocation8 + $0x30] ss:$8 sps:$4 sm:$0xff]   ;;  %v812_v27 = vld [vmem:[#allocation7 + $0x84] ss:$8 sps:$4 sm:$0xff]  }
  0x62   :  { %v93_v26 = vld [vmem:[#allocation2 + $0x8] sm:$0xff]  ;;  %v850_v29 = vld [vmem:[#allocation10 + $0x4] ss:$8 sps:$4 sm:$0xff]   ;;  %v814_v31 = vld [vmem:[#allocation7 + $0x80] ss:$8 sps:$4 sm:$0xff]   ;;  %vm178_vm0 = vcmask 523264  }
  0x63   :  { %388 = vmatpush1.bf16.msra.mxu1 %v796_v6  ;;  %185 = vmatpush1.bf16.msra.mxu0 %v832_v16  ;;  %v95_v28 = vpack.c.bf16 %v93_v26, %v93_v26  ;;  %v848_v32 = vld [vmem:[#allocation10] ss:$8 sps:$4 sm:$0xff]   ;;  %v815_v33 = vld [vmem:[#allocation7 + $0x94] ss:$8 sps:$4 sm:$0xff]   ;;  %v817_v35 = vld [vmem:[#allocation7 + $0x90] ss:$8 sps:$4 sm:$0xff]  }
  0x64   :  { %389 = vmatprep.subr.bf16.mxu1 %v797_v7  ;;  %186 = vmatprep.subr.bf16.mxu0 %v835_v18  ;;  %v853_v34 = vld [vmem:[#allocation10 + $0x14] ss:$8 sps:$4 sm:$0xff]   ;;  %v851_v36 = vld [vmem:[#allocation10 + $0x10] ss:$8 sps:$4 sm:$0xff]   ;;  %v818_v37 = vld [vmem:[#allocation7 + $0xa4] ss:$8 sps:$4 sm:$0xff]  }
  0x65   :  { %415 = vmatprep.mubr.bf16.mxu1 %v95_v28  ;;  %v856_v38 = vld [vmem:[#allocation10 + $0x24] ss:$8 sps:$4 sm:$0xff]   ;;  %v820_v39 = vld [vmem:[#allocation7 + $0xa0] ss:$8 sps:$4 sm:$0xff]   ;;  %v821_v41 = vld [vmem:[#allocation7 + $0xb4] ss:$8 sps:$4 sm:$0xff]  }
  0x66   :  { %v854_v40 = vld [vmem:[#allocation10 + $0x20] ss:$8 sps:$4 sm:$0xff]   ;;  %v859_v42 = vld [vmem:[#allocation10 + $0x34] ss:$8 sps:$4 sm:$0xff]   ;;  %v825_v43 = vld [vmem:[#allocation7 + $0xb0] ss:$8 sps:$4 sm:$0xff]  }
  0x67   :  { %390 = vmatpush1.bf16.msra.mxu1 %v799_v8  ;;  %187 = vmatpush1.bf16.msra.mxu0 %v838_v20  ;;  %v857_v44 = vld [vmem:[#allocation10 + $0x30] ss:$8 sps:$4 sm:$0xff]   ;;  %v827_v45 = vld [vmem:[#allocation7 + $0xc4] ss:$8 sps:$4 sm:$0xff]   ;;  %v831_v47 = vld [vmem:[#allocation7 + $0xc0] ss:$8 sps:$4 sm:$0xff]  }
  0x68   :  { %391 = vmatprep.subr.bf16.mxu1 %v800_v9  ;;  %188 = vmatprep.subr.bf16.mxu0 %v841_v22  ;;  %v862_v46 = vld [vmem:[#allocation10 + $0x44] ss:$8 sps:$4 sm:$0xff]   ;;  %v860_v48 = vld [vmem:[#allocation10 + $0x40] ss:$8 sps:$4 sm:$0xff]   ;;  %v833_v49 = vld [vmem:[#allocation7 + $0xd4] ss:$8 sps:$4 sm:$0xff]  }
  0x69   :  { %v865_v50 = vld [vmem:[#allocation10 + $0x54] ss:$8 sps:$4 sm:$0xff]   ;;  %v837_v51 = vld [vmem:[#allocation7 + $0xd0] ss:$8 sps:$4 sm:$0xff]   ;;  %v839_v53 = vld [vmem:[#allocation7 + $0xe4] ss:$8 sps:$4 sm:$0xff]  }
  0x6a   :  { %v863_v52 = vld [vmem:[#allocation10 + $0x50] ss:$8 sps:$4 sm:$0xff]   ;;  %v868_v54 = vld [vmem:[#allocation10 + $0x64] ss:$8 sps:$4 sm:$0xff]   ;;  %v843_v55 = vld [vmem:[#allocation7 + $0xe0] ss:$8 sps:$4 sm:$0xff]  }
  0x6b   :  { %392 = vmatpush1.bf16.msra.mxu1 %v802_v10  ;;  %189 = vmatpush1.bf16.msra.mxu0 %v844_v24  ;;  %v866_v56 = vld [vmem:[#allocation10 + $0x60] ss:$8 sps:$4 sm:$0xff]   ;;  %v845_v57 = vld [vmem:[#allocation7 + $0xf4] ss:$8 sps:$4 sm:$0xff]   ;;  %v847_v59 = vld [vmem:[#allocation7 + $0xf0] ss:$8 sps:$4 sm:$0xff]  }
  0x6c   :  { %393 = vmatprep.subr.bf16.mxu1 %v803_v11  ;;  %646 = vmatprep.subr.bf16.mxu0 %v850_v29  ;;  %v871_v58 = vld [vmem:[#allocation10 + $0x74] ss:$8 sps:$4 sm:$0xff]   ;;  %v92_v60 = vld [vmem:[#allocation2] sm:$0xff]  ;;  %v869_v61 = vld [vmem:[#allocation10 + $0x70] ss:$8 sps:$4 sm:$0xff]  }
  0x6d   :  { %v874_v62 = vld [vmem:[#allocation10 + $0x84] ss:$8 sps:$4 sm:$0xff]   ;;  %v94_v63 = vpack.c.bf16 %v92_v60, %v92_v60  ;;  %v872_v0 = vld [vmem:[#allocation10 + $0x80] ss:$8 sps:$4 sm:$0xff]   ;;  %v877_v1 = vld [vmem:[#allocation10 + $0x94] ss:$8 sps:$4 sm:$0xff]  }
  0x6e   :  { %714 = vmatmul.mubr.msk.bf16.vlgmr.msra.gmra.mrb[0].mxu0 %vm178_vm0, %v129_v30  ;;  %v875_v2 = vld [vmem:[#allocation10 + $0x90] ss:$8 sps:$4 sm:$0xff]   ;;  %v880_v3 = vld [vmem:[#allocation10 + $0xa4] ss:$8 sps:$4 sm:$0xff]   ;;  %v878_v4 = vld [vmem:[#allocation10 + $0xa0] ss:$8 sps:$4 sm:$0xff]  }
  0x6f   :  { %394 = vmatpush1.bf16.msra.mxu1 %v805_v14  ;;  %647 = vmatpush1.bf16.msra.mxu0 %v848_v32  ;;  %v883_v5 = vld [vmem:[#allocation10 + $0xb4] ss:$8 sps:$4 sm:$0xff]   ;;  %v881_v6 = vld [vmem:[#allocation10 + $0xb0] ss:$8 sps:$4 sm:$0xff]   ;;  %v886_v7 = vld [vmem:[#allocation10 + $0xc4] ss:$8 sps:$4 sm:$0xff]  }
  0x70   :  { %395 = vmatprep.subr.bf16.mxu1 %v806_v17  ;;  %648 = vmatprep.subr.bf16.mxu0 %v853_v34  ;;  %v884_v8 = vld [vmem:[#allocation10 + $0xc0] ss:$8 sps:$4 sm:$0xff]   ;;  %v887_v9 = vld [vmem:[#allocation10 + $0xd0] ss:$8 sps:$4 sm:$0xff]   ;;  %v889_v10 = vld [vmem:[#allocation10 + $0xd4] ss:$8 sps:$4 sm:$0xff]  }
  0x71   :  { %v892_v11 = vld [vmem:[#allocation10 + $0xe4] ss:$8 sps:$4 sm:$0xff]   ;;  %v890_v12 = vld [vmem:[#allocation10 + $0xe0] ss:$8 sps:$4 sm:$0xff]   ;;  %v895_v13 = vld [vmem:[#allocation10 + $0xf4] ss:$8 sps:$4 sm:$0xff]  }
  0x72   :  { %v893_v14 = vld [vmem:[#allocation10 + $0xf0] ss:$8 sps:$4 sm:$0xff]   ;;  %v424_v22 = vld [vmem:[%s1176_s4] sm:$0x3]  ;;  %s1044_s4 = smov [#allocation11]  }
  0x73   :  { %396 = vmatpush1.bf16.msra.mxu1 %v808_v19  ;;  %649 = vmatpush1.bf16.msra.mxu0 %v851_v36  ;;  %v426_v19 = vlaneseq  ;;  %s695_s14 = sshll.u32 %s1044_s4, 4  ;;  %s696_s14 = int_to_ptr.vmem [resolvable:$true] %s695_s14 }
  0x74   :  { %397 = vmatprep.subr.bf16.mxu1 %v809_v21  ;;  %650 = vmatprep.subr.bf16.mxu0 %v856_v38  ;;  %v474_v38 = vld [vmem:[%s1178_s6] sm:$0x3]  ;;  %s1006_s15 = scalar_lea.vmem %s696_s14, 256  ;;  %p1011_p13 = scmp.lt.s32.totalorder %s696_s14, %s696_s14 }
  0x75   :  { %v427_v20 = vshrl.u32 %v426_v19, 7  ;;  %p1007_p12 = scmp.ne.s32.totalorder %s696_s14, %s1006_s15  ;;  %p1012_p0 = scmp.lt.s32.totalorder %s1006_s15, %s1006_s15 }
  0x77   :  { %398 = vmatpush1.bf16.msra.mxu1 %v811_v23  ;;  %651 = vmatpush1.bf16.msra.mxu0 %v854_v40  ;;  %v428_v21 = vsub.s32 0, %v427_v20  ;;  %v432_v23 = vsub.s32 1, %v427_v20  ;;  %p1013_p1 = por %p1012_p0, %p1011_p13 }
  0x78   :  { %399 = vmatprep.subr.bf16.mxu1 %v812_v27  ;;  %652 = vmatprep.subr.bf16.mxu0 %v859_v42 }
  0x79   :  { %v429_v24 = vrot.slane %v424_v22, %v428_v21  ;;  %v433_v26 = vrot.slane %v424_v22, %v432_v23  ;;  %v483_v40 = vrot.slane %v474_v38, %v432_v23  ;;  %p1014_p2 = pnand %p1013_p1, %p1007_p12 }
  0x7b   :  { %400 = vmatpush1.bf16.msra.mxu1 %v814_v31  ;;  %653 = vmatpush1.bf16.msra.mxu0 %v857_v44 }
  0x7c   :  { %401 = vmatprep.subr.bf16.mxu1 %v815_v33  ;;  %654 = vmatprep.subr.bf16.mxu0 %v862_v46 }
  0x7f   :  { %402 = vmatpush1.bf16.msra.mxu1 %v817_v35  ;;  %655 = vmatpush1.bf16.msra.mxu0 %v860_v48 }
  0x80   :  { %403 = vmatprep.subr.bf16.mxu1 %v818_v37  ;;  %656 = vmatprep.subr.bf16.mxu0 %v865_v50 }
  0x83   :  { %404 = vmatpush1.bf16.msra.mxu1 %v820_v39  ;;  %657 = vmatpush1.bf16.msra.mxu0 %v863_v52  ;;  %v479_v39 = vrot.slane %v474_v38, %v428_v21 }
  0x84   :  { %405 = vmatprep.subr.bf16.mxu1 %v821_v41  ;;  %658 = vmatprep.subr.bf16.mxu0 %v868_v54 }
  0x87   :  { %406 = vmatpush1.bf16.msra.mxu1 %v825_v43  ;;  %659 = vmatpush1.bf16.msra.mxu0 %v866_v56 }
  0x88   :  { %407 = vmatprep.subr.bf16.mxu1 %v827_v45  ;;  %660 = vmatprep.subr.bf16.mxu0 %v871_v58 }
  0x8b   :  { %408 = vmatpush1.bf16.msra.mxu1 %v831_v47  ;;  %661 = vmatpush1.bf16.msra.mxu0 %v869_v61 }
  0x8c   :  { %409 = vmatprep.subr.bf16.mxu1 %v833_v49  ;;  %662 = vmatprep.subr.bf16.mxu0 %v874_v62 }
  0x8f   :  { %410 = vmatpush1.bf16.msra.mxu1 %v837_v51  ;;  %663 = vmatpush1.bf16.msra.mxu0 %v872_v0 }
  0x90   :  { %411 = vmatprep.subr.bf16.mxu1 %v839_v53  ;;  %664 = vmatprep.subr.bf16.mxu0 %v877_v1 }
  0x93   :  { %412 = vmatpush1.bf16.msra.mxu1 %v843_v55  ;;  %665 = vmatpush1.bf16.msra.mxu0 %v875_v2 }
  0x94   :  { %413 = vmatprep.subr.bf16.mxu1 %v845_v57  ;;  %666 = vmatprep.subr.bf16.mxu0 %v880_v3 }
  0x97   :  { %414 = vmatpush1.bf16.msra.mxu1 %v847_v59  ;;  %667 = vmatpush1.bf16.msra.mxu0 %v878_v4 }
  0x98   :  { %668 = vmatprep.subr.bf16.mxu0 %v883_v5 }
  0x9a   :  { %416 = vmatmul.mubr.bf16.vlgmr.msra.gmra.mrb[0].mxu1 %v94_v63 }
  0x9b   :  { %669 = vmatpush1.bf16.msra.mxu0 %v881_v6 }
  0x9c   :  { %670 = vmatprep.subr.bf16.mxu0 %v886_v7 }
  0x9f   :  { %671 = vmatpush1.bf16.msra.mxu0 %v884_v8 }
  0xa0   :  { %672 = vmatprep.subr.bf16.mxu0 %v889_v10 }
  0xa3   :  { %673 = vmatpush1.bf16.msra.mxu0 %v887_v9 }
  0xa4   :  { %674 = vmatprep.subr.bf16.mxu0 %v892_v11 }
  0xa7   :  { %675 = vmatpush1.bf16.msra.mxu0 %v890_v12 }
  0xa8   :  { %676 = vmatprep.subr.bf16.mxu0 %v895_v13 }
  0xab   :  { %677 = vmatpush1.bf16.msra.mxu0 %v893_v14 }
 0x141   :  { %v216_v15 = vpop.f32.mrb[0].mxu0 }
 0x142   :  { %v218_v16 = vpop.f32.mrb[1].mxu0 }
 0x143   :  { %v220_v17 = vpop.f32.mrb[2].mxu0 }
 0x144   :  { %v221_v18 = vpop.f32.mrb[3].mxu0 }
 0x16d   :  { %v417_v25 = vpop.f32.mrb[0].mxu1 }
 0x16e   :  { %v418_v27 = vadd.f32 %v417_v25, %v216_v15  ;;  %v419_v28 = vpop.f32.mrb[1].mxu1 }
 0x16f   :  { %v420_v29 = vadd.f32 %v419_v28, %v218_v16  ;;  %v421_v30 = vpop.f32.mrb[2].mxu1 }
 0x170   :  { %v436_v31 = vadd.f32 %v429_v24, %v418_v27  ;;  %v422_v32 = vpop.f32.mrb[3].mxu1 }
 0x171   :  { %v437_v33 = vadd.f32 %v433_v26, %v420_v29 }
 0x172   :  { %v438_v34 = vmax.f32 %v436_v31, 0.0 }
 0x173   :  { %v439_v35 = vmax.f32 %v437_v33, 0.0 }
 0x174   :  { %v440_v37 = vpack.c.bf16 %v438_v34, %v438_v34 }
 0x175   :  { %v441_v36 = vpack.c.bf16 %v439_v35, %v439_v35 }
 0x177   :  { %678 = vmatprep.mubr.bf16.mxu0 %v441_v36 }
 0x178   :  { %679 = vmatmul.mubr.bf16.vlgmr.msra.gmra.mrb[4].mxu0 %v440_v37 }
 0x24b   :  { %v680_v41 = vpop.f32.mrb[4].mxu0 }
 0x24c   :  { %v681_v42 = vadd.f32 %v680_v41, %v479_v39  ;;  %v682_v43 = vpop.f32.mrb[5].mxu0 }
 0x24d   :  { %v683_v44 = vadd.f32 %v682_v43, %v483_v40  ;;  %v684_v45 = vpop.f32.mrb[6].mxu0 }
 0x24e   :  { %687 = vst [vmem:[#allocation11] sm:$0xff] %v681_v42  ;;  %v685_v46 = vpop.f32.mrb[7].mxu0 }
 0x24f   :  { %688 = vst [vmem:[#allocation11 + $0x8] sm:$0xff] %v683_v44 }
 0x250   :  { %1017 = shalt.err (!%p1014_p2)
}
 0x251   :  { %s1018_s18 = scalar_lea.hbm %s1179_s7, 256 }
 0x252   :  { %p1019_p3 = scmp.ne.s32.totalorder %s1179_s7, %s1018_s18  ;;  %p1022_p4 = scmp.lt.u32.totalorder %s1018_s18, %s1179_s7 }
 0x254   :  { %p1024_p5 = pnand %p1022_p4, %p1019_p3 }
 0x256   :  { %1027 = shalt.err (!%p1024_p5)
}
 0x257   :  { %698 = dma.vmem_to_hbm [thread:$0]  %s696_s14, 256, %s1179_s7, [#allocation4]  }
 0x258   :  { %1034 = dma.done.wait [#allocation4], 256  }
 0x259   :  { %1035 = vsyncadd [#allocation4], 4294967040 }
 0x25a   :  { %702 = vsyncpa [#allocation3], 1 }
 0x25b   :  { %703 = vsyncpa [#allocation6], 1 }
 0x25c   :  { %704 = vsyncpa [#allocation9], 1 }
 0x25d   :  { %705 = vsyncpa [#allocation4], 1 }

</bundles_post_ra>
